<compile_context>
chip_gen: v6e
topology: v6e:2x2x1
jax: 0.10.0
libtpu: 0.0.40
codegen_flags: <defaults>
</compile_context>

<pallas_src>
import functools

import jax
import jax.numpy as jnp
from jax.experimental import pallas as pl
from jax.experimental.pallas import tpu as pltpu

LANE = 128     # TPU lane width (last-dim granularity for dense stores)
SUBLANE = 8    # TPU sublane width (f32)


def _round_up(x, m):
    return (x + m - 1) // m * m


def qnet_kernel(x_ref, w1_ref, b1_ref, w2_ref, b2_ref, out_ref):
    """Fused 2-layer MLP: out = relu(x @ W1 + b1) @ W2 + b2.

    Weights arrive pre-transposed to [in, out] and lane-padded; both matmuls
    run on the MXU with f32 accumulation, bias add + ReLU on the VPU in f32.
    """
    x = x_ref[...]
    w1 = w1_ref[...]
    # Cast activations to the weight dtype (bf16 weights -> bf16 MXU path on
    # v6e/v7x); always accumulate in f32.
    h = jnp.dot(x.astype(w1.dtype), w1, preferred_element_type=jnp.float32)
    h = jnp.maximum(h + b1_ref[...].astype(jnp.float32), 0.0)
    w2 = w2_ref[...]
    o = jnp.dot(h.astype(w2.dtype), w2, preferred_element_type=jnp.float32)
    o = o + b2_ref[...].astype(jnp.float32)
    out_ref[...] = o.astype(out_ref.dtype)


def prepare_qnet_params(w1, b1, w2, b2, *, compute_dtype=None):
    """One-time conversion of nn.Linear-layout params to the kernel layout.

    Inputs (PyTorch nn.Linear layout):
        w1: [hid, in], b1: [hid], w2: [out, hid], b2: [out]
    Returns a dict with:
        w1_t: [in, hid]             (optionally cast to compute_dtype, e.g. bf16)
        b1:   [1, hid]    f32
        w2_t: [hid, out_pad]        zero-padded to a multiple of 128 lanes
        b2:   [1, out_pad] f32      zero-padded
        out_len: true output width (used for the wrapper-side slice)
    """
    hid, _in_len = w1.shape
    out_len = w2.shape[0]
    out_pad = _round_up(out_len, LANE)

    w1_t = jnp.asarray(w1).T                                    # [in, hid]
    w2_t = jnp.pad(jnp.asarray(w2).T, ((0, 0), (0, out_pad - out_len)))
    b1_2d = jnp.asarray(b1, jnp.float32).reshape(1, hid)
    b2_2d = jnp.pad(jnp.asarray(b2, jnp.float32).reshape(1, out_len),
                    ((0, 0), (0, out_pad - out_len)))
    if compute_dtype is not None:
        w1_t = w1_t.astype(compute_dtype)
        w2_t = w2_t.astype(compute_dtype)
    return dict(w1_t=w1_t, b1=b1_2d, w2_t=w2_t, b2=b2_2d, out_len=out_len)


def qnet_forward(state, params, *, batch_tile=None):
    """state: [B, in_len] -> Q-values [B, out_len]."""
    w1_t, b1 = params["w1_t"], params["b1"]
    w2_t, b2 = params["w2_t"], params["b2"]
    out_len = params["out_len"]
    in_len, hid = w1_t.shape
    out_pad = w2_t.shape[1]
    B = state.shape[0]

    vmem = pltpu.MemorySpace.VMEM

    if batch_tile is None or B <= batch_tile:
        # Small-batch / inference path: no grid, no pipelining machinery.
        # Every array is one full block resident in VMEM (launch-overhead
        # regime -- keep the fixed costs minimal).
        out = pl.pallas_call(
            qnet_kernel,
            out_shape=jax.ShapeDtypeStruct((B, out_pad), state.dtype),
            in_specs=[pl.BlockSpec(memory_space=vmem)] * 5,
            out_specs=pl.BlockSpec(memory_space=vmem),
        )(state, w1_t, b1, w2_t, b2)
        return out[:, :out_len]

    # Batched path (replay batches / vectorized envs): tile the batch. Weights
    # and biases use a constant index_map so they stay VMEM-resident across
    # grid steps; the batch axis is "parallel" so v7x shards it across both
    # TensorCores and the auto-pipeline overlaps tile i+1 DMA with compute.
    tb = batch_tile
    b_pad = _round_up(B, tb)
    if b_pad != B:
        state = jnp.pad(state, ((0, b_pad - B), (0, 0)))
    out = pl.pallas_call(
        qnet_kernel,
        out_shape=jax.ShapeDtypeStruct((b_pad, out_pad), state.dtype),
        grid=(b_pad // tb,),
        in_specs=[
            pl.BlockSpec((tb, in_len), lambda i: (i, 0)),
            pl.BlockSpec((in_len, hid), lambda i: (0, 0)),
            pl.BlockSpec((1, hid), lambda i: (0, 0)),
            pl.BlockSpec((hid, out_pad), lambda i: (0, 0)),
            pl.BlockSpec((1, out_pad), lambda i: (0, 0)),
        ],
        out_specs=pl.BlockSpec((tb, out_pad), lambda i: (i, 0)),
        compiler_params=pltpu.CompilerParams(
            dimension_semantics=("parallel",)),
    )(state, w1_t, b1, w2_t, b2)
    return out[:B, :out_len]


def init_qnet_params(key, input_len, hidden_len, output_len, dtype=jnp.float32):
    """Deterministic init mimicking nn.Linear default (uniform +/- 1/sqrt(fan_in))."""
    k1, k2, k3, k4 = jax.random.split(key, 4)
    bound1 = 1.0 / jnp.sqrt(jnp.float32(input_len))
    bound2 = 1.0 / jnp.sqrt(jnp.float32(hidden_len))
    w1 = jax.random.uniform(k1, (hidden_len, input_len), dtype, -bound1, bound1)
    b1 = jax.random.uniform(k2, (hidden_len,), dtype, -bound1, bound1)
    w2 = jax.random.uniform(k3, (output_len, hidden_len), dtype, -bound2, bound2)
    b2 = jax.random.uniform(k4, (output_len,), dtype, -bound2, bound2)
    return w1, b1, w2, b2


# TODO(synk): Qnet.save() (torch.save file I/O) has no kernel equivalent; only
# the forward pass is implemented here.

if __name__ == "__main__":
    key = jax.random.PRNGKey(0)
    B, input_len, hidden_len, output_len = 8, 16, 32, 4

    kx, kp, kb = jax.random.split(key, 3)
    state = jax.random.normal(kx, (B, input_len), jnp.float32)
    w1, b1, w2, b2 = init_qnet_params(kp, input_len, hidden_len, output_len)

    # One-time layout prep (transpose / pad / reshape) -- NOT per forward call.
    params = prepare_qnet_params(w1, b1, w2, b2)

    def ref(x):
        h = jnp.maximum(x @ w1.T + b1, 0.0)
        return h @ w2.T + b2

    # Small-batch path: gridless, everything a single resident VMEM block.
    qnet_small = jax.jit(lambda s: qnet_forward(s, params))
    out = jax.block_until_ready(qnet_small(state))
    assert out.shape == (B, output_len)
    assert jnp.allclose(out, ref(state), atol=1e-5, rtol=1e-5)

    # Batched path: batch-tiled grid with a parallel axis, resident weights.
    BB, TB = 512, 128
    big_state = jax.random.normal(kb, (BB, input_len), jnp.float32)
    qnet_big = jax.jit(lambda s: qnet_forward(s, params, batch_tile=TB))
    big_out = jax.block_until_ready(qnet_big(big_state))
    assert big_out.shape == (BB, output_len)
    assert jnp.allclose(big_out, ref(big_state), atol=1e-5, rtol=1e-5)

    print("KERNEL_OK")
</pallas_src>

<mosaic_0001>
module attributes {stable_mosaic.version = 11 : i64} {
  func.func @qnet_kernel(%arg0: memref<8x16xf32, #tpu.memory_space<vmem>>, %arg1: memref<16x32xf32, #tpu.memory_space<vmem>>, %arg2: memref<1x32xf32, #tpu.memory_space<vmem>>, %arg3: memref<32x128xf32, #tpu.memory_space<vmem>>, %arg4: memref<1x128xf32, #tpu.memory_space<vmem>>, %arg5: memref<8x128xf32, #tpu.memory_space<vmem>>) attributes {dimension_semantics = [], scalar_prefetch = 0 : i64, scratch_operands = 0 : i64, tpu.core_type = #tpu.core_type<tc>} {
    %c0 = arith.constant 0 : index
    %c0_0 = arith.constant 0 : index
    %0 = vector.load %arg0[%c0, %c0_0] : memref<8x16xf32, #tpu.memory_space<vmem>>, vector<8x16xf32>
    %c0_1 = arith.constant 0 : index
    %c0_2 = arith.constant 0 : index
    %1 = vector.load %arg1[%c0_1, %c0_2] : memref<16x32xf32, #tpu.memory_space<vmem>>, vector<16x32xf32>
    %cst = arith.constant dense<0.000000e+00> : vector<8x32xf32>
    %2 = tpu.matmul %0, %1, %cst {dimension_numbers = #tpu.dot_dimension_numbers<[1], [0], [0], [1], [0, 0, 1, 1], [], []>} : vector<8x16xf32>, vector<16x32xf32>, vector<8x32xf32> -> vector<8x32xf32>
    %c0_3 = arith.constant 0 : index
    %c0_4 = arith.constant 0 : index
    %3 = vector.load %arg2[%c0_3, %c0_4] : memref<1x32xf32, #tpu.memory_space<vmem>>, vector<1x32xf32>
    %4 = vector.broadcast %3 : vector<1x32xf32> to vector<8x32xf32>
    %5 = arith.addf %2, %4 : vector<8x32xf32>
    %cst_5 = arith.constant 0.000000e+00 : f32
    %6 = vector.broadcast %cst_5 : f32 to vector<8x32xf32>
    %7 = arith.maximumf %5, %6 : vector<8x32xf32>
    %c0_6 = arith.constant 0 : index
    %c0_7 = arith.constant 0 : index
    %8 = vector.load %arg3[%c0_6, %c0_7] : memref<32x128xf32, #tpu.memory_space<vmem>>, vector<32x128xf32>
    %cst_8 = arith.constant dense<0.000000e+00> : vector<8x128xf32>
    %9 = tpu.matmul %7, %8, %cst_8 {dimension_numbers = #tpu.dot_dimension_numbers<[1], [0], [0], [1], [0, 0, 1, 1], [], []>} : vector<8x32xf32>, vector<32x128xf32>, vector<8x128xf32> -> vector<8x128xf32>
    %c0_9 = arith.constant 0 : index
    %c0_10 = arith.constant 0 : index
    %10 = vector.load %arg4[%c0_9, %c0_10] : memref<1x128xf32, #tpu.memory_space<vmem>>, vector<1x128xf32>
    %11 = vector.broadcast %10 : vector<1x128xf32> to vector<8x128xf32>
    %12 = arith.addf %9, %11 : vector<8x128xf32>
    %c0_11 = arith.constant 0 : index
    %c0_12 = arith.constant 0 : index
    %13 = vector.load %arg5[%c0_11, %c0_12] : memref<8x128xf32, #tpu.memory_space<vmem>>, vector<8x128xf32>
    tpu.vector_store %arg5[%c0_11, %c0_12], %12 {strides = array<i32>} : memref<8x128xf32, #tpu.memory_space<vmem>>, vector<8x128xf32>,
    return
  }
}

</mosaic_0001>

<bundles_post_ra>
// kernel: _lambda_.1
= control target key start
LH: loop header
LB: loop body
LE: loop exit
PB: predicated region body
PF: predicated region fallthrough
CT: control target
= control target key end

     0   :  { %10 = vsyncpa [#allocation3], 0  ;;  %s392_s0 = inlined_call_operand.hbm [shape: f32[8,16], index: 0, kind: input, shape index: {}]   ;;  %s393_s1 = inlined_call_operand.hbm [shape: f32[16,32], index: 1, kind: input, shape index: {}]   ;;  %s394_s2 = inlined_call_operand.vmem [shape: f32[1,32], index: 2, kind: input, shape index: {}]   ;;  %s395_s3 = inlined_call_operand.hbm [shape: f32[32,128], index: 3, kind: input, shape index: {}]   ;;  %s396_s4 = inlined_call_operand.vmem [shape: f32[1,128], index: 4, kind: input, shape index: {}]   ;;  %s397_s5 = inlined_call_operand.vmem [shape: f32[8,128], index: 5, kind: output, shape index: {}]  }
   0x1   :  { %11 = vsyncpa [#allocation5], 0  ;;  %s337_s18 = smov [#allocation4]  }
   0x2   :  { %s27_s19 = sshll.u32 %s337_s18, 4  ;;  %s28_s19 = int_to_ptr.vmem [resolvable:$true] %s27_s19 }
   0x3   :  { %s281_s20 = scalar_lea.vmem %s28_s19, 256  ;;  %p286_p1 = scmp.lt.s32.totalorder %s28_s19, %s28_s19 }
   0x4   :  { %p282_p0 = scmp.ne.s32.totalorder %s28_s19, %s281_s20  ;;  %p287_p2 = scmp.lt.s32.totalorder %s281_s20, %s281_s20 }
   0x6   :  { %p288_p3 = por %p287_p2, %p286_p1 }
   0x8   :  { %p289_p4 = pnand %p288_p3, %p282_p0 }
   0xa   :  { %292 = shalt.err (!%p289_p4)
}
   0xb   :  { %s338_s21 = smov 128   ;;  %s339_s22 = smov 8  }
   0xc   :  { %33 = dma.hbm_to_vmem [thread:$0]  %s393_s1, 256, %s28_s19, [#allocation5], %s338_s21, %s338_s21, %s339_s22  }
   0xd   :  { %s340_s25 = smov [#allocation2]   ;;  %s341_s27 = smov [#allocation6]  }
   0xe   :  { %s18_s26 = sshll.u32 %s340_s25, 4  ;;  %s41_s28 = sshll.u32 %s341_s27, 4  ;;  %s19_s26 = int_to_ptr.vmem [resolvable:$true] %s18_s26  ;;  %s42_s28 = int_to_ptr.vmem [resolvable:$true] %s41_s28 }
   0xf   :  { %s301_s29 = scalar_lea.vmem %s19_s26, 128  ;;  %p306_p6 = scmp.lt.s32.totalorder %s19_s26, %s19_s26 }
  0x10   :  { %p302_p5 = scmp.ne.s32.totalorder %s19_s26, %s301_s29  ;;  %p307_p7 = scmp.lt.s32.totalorder %s301_s29, %s301_s29 }
  0x12   :  { %p308_p8 = por %p307_p7, %p306_p6 }
  0x14   :  { %p309_p9 = pnand %p308_p8, %p302_p5 }
  0x16   :  { %312 = shalt.err (!%p309_p9)
}
  0x17   :  { %21 = dma.hbm_to_vmem [thread:$0]  %s392_s0, 128, %s19_s26, [#allocation3]  }
  0x18   :  { %s321_s7 = scalar_lea.vmem %s42_s28, 512  ;;  %p326_p11 = scmp.lt.s32.totalorder %s42_s28, %s42_s28 }
  0x19   :  { %p322_p10 = scmp.ne.s32.totalorder %s42_s28, %s321_s7  ;;  %p327_p12 = scmp.lt.s32.totalorder %s321_s7, %s321_s7 }
  0x1b   :  { %p328_p13 = por %p327_p12, %p326_p11 }
  0x1d   :  { %p329_p0 = pnand %p328_p13, %p322_p10 }
  0x1f   :  { %332 = shalt.err (!%p329_p0)
}
  0x20   :  { %47 = dma.hbm_to_vmem [thread:$0]  %s395_s3, 512, %s42_s28, [#allocation5], %s338_s21, %s338_s21, %s339_s22  }
  0x21   :  { %333 = dma.done.wait [#allocation3], 128  }
  0x22   :  { %334 = vsyncadd [#allocation3], 4294967168 }
  0x23   :  { %335 = dma.done.wait [#allocation5], 768  }
  0x24   :  { %336 = vsyncadd [#allocation5], 4294966528  ;;  %v342_v0 = vmov 0.0   ;;  %vm343_vm0 = vmmov 0   ;;  %v61_v1 = vld [vmem:[#allocation4 + $0x8] sm:$0xff]  ;;  %v60_v2 = vld [vmem:[#allocation4] sm:$0xff] }
  0x25   :  { %248 = vmatprep.subr.mxu0 %v342_v0  ;;  %252 = vmatprep.mubr.msk.f32.mxu0 %vm343_vm0, %v342_v0  ;;  %v59_v3 = vld [vmem:[#allocation2] sm:$0xff]  ;;  %vm69_vm1 = vcmask 130048   ;;  %v147_v4 = vld [vmem:[#allocation6 + $0x18] sm:$0xff]  ;;  %v146_v5 = vld [vmem:[#allocation6 + $0x10] sm:$0xff]  ;;  %vm155_vm2 = vcmask 261120  }
  0x26   :  { %255 = vmatprep.subr.mxu1 %v342_v0  ;;  %263 = vmatprep.mubr.msk.f32.mxu1 %vm343_vm0, %v342_v0  ;;  %v145_v6 = vld [vmem:[#allocation6 + $0x8] sm:$0xff]  ;;  %v144_v7 = vld [vmem:[#allocation6] sm:$0xff] }
  0x27   :  { %249 = vmatpush3.msra.mxu0 %v61_v1  ;;  %256 = vmatpush3.msra.mxu1 %v147_v4  ;;  %v236_v8 = vld [vmem:[%s394_s2] ss:$0 sm:$0xff] }
  0x28   :  { %250 = vmatprep.subr.mxu0 %v342_v0  ;;  %257 = vmatprep.subr.mxu1 %v342_v0  ;;  %v238_v13 = vld [vmem:[%s396_s4] ss:$0 sm:$0xff] }
  0x29   :  { %251 = vmatpush3.msra.mxu0 %v60_v2  ;;  %258 = vmatpush3.msra.mxu1 %v146_v5 }
  0x2a   :  { %253 = vmatmul.mubr.msk.f32.vlgmr.msra.gmra.mxu0 %vm69_vm1, %v59_v3  ;;  %259 = vmatprep.subr.mxu1 %v342_v0 }
  0x2b   :  { %260 = vmatpush3.msra.mxu1 %v145_v6 }
  0x2c   :  { %261 = vmatprep.subr.mxu1 %v342_v0 }
  0x2d   :  { %262 = vmatpush3.msra.mxu1 %v144_v7 }
  0xea   :  { %v139_v9 = vpop.f32.mrf.mxu0 }
  0xeb   :  { %v140_v10 = vadd.f32 %v236_v8, %v139_v9 }
  0xec   :  { %v254_v11 = vpop.f32.mrf.mxu0 }
  0xed   :  { %v143_v12 = vmax.f32 %v140_v10, 0.0 }
  0xef   :  { %264 = vmatmul.mubr.msk.f32.vlgmr.msra.gmra.mxu1 %vm155_vm2, %v143_v12 }
 0x1af   :  { %v225_v14 = vpop.f32.mrf.mxu1 }
 0x1b0   :  { %v226_v15 = vadd.f32 %v238_v13, %v225_v14 }
 0x1b1   :  { %v265_v16 = vpop.f32.mrf.mxu1 }
 0x1b2   :  { %229 = vst [vmem:[%s397_s5] sm:$0xff] %v226_v15 }
 0x1b3   :  { %234 = vsyncpa [#allocation3], 1 }
 0x1b4   :  { %235 = vsyncpa [#allocation5], 1 }

</bundles_post_ra>
